<compile_context>
chip_gen: v5e
topology: v5e:2x2
jax: 0.10.0
libtpu: 0.0.40
codegen_flags: <defaults>
</compile_context>

<pallas_src>
import functools

import jax
import jax.numpy as jnp
from jax.experimental import pallas as pl
from jax.experimental.pallas import tpu as pltpu


def _round_up(x, m):
    return ((x + m - 1) // m) * m


def _policy_kernel(x_ref, w1_ref, b1_ref, w2_ref, b2_ref, wh_ref, bh_ref,
                   lo_ref, hi_ref, out_ref):
    # fc1 + relu  (bf16 MXU matmul, f32 accumulation, f32 bias add),
    # cast to bf16 immediately so the f32 intermediate dies right away.
    h1 = jnp.dot(x_ref[...].astype(jnp.bfloat16), w1_ref[...],
                 preferred_element_type=jnp.float32)
    h1 = jnp.maximum(h1 + b1_ref[...], 0.0).astype(jnp.bfloat16)

    # fc2 + relu
    h2 = jnp.dot(h1, w2_ref[...], preferred_element_type=jnp.float32)
    h2 = jnp.maximum(h2 + b2_ref[...], 0.0).astype(jnp.bfloat16)

    # fused heads: columns [0, A) are mu, [A, 2A) are log_std, rest zero pad
    head = jnp.dot(h2, wh_ref[...], preferred_element_type=jnp.float32)
    head = head + bh_ref[...]

    # Clamp via precomputed per-column lo/hi vectors: mu columns get
    # (-inf, +inf) (no-op), log_std columns get (log_std_min, log_std_max).
    out_ref[...] = jnp.minimum(jnp.maximum(head, lo_ref[...]), hi_ref[...])


def _resident_spec(shape):
    """Grid-invariant (VMEM-resident) weight tile; single-buffered if supported."""
    try:
        return pl.BlockSpec(shape, lambda i: (0, 0),
                            pipeline_mode=pl.Buffered(1))
    except (TypeError, AttributeError):
        return pl.BlockSpec(shape, lambda i: (0, 0))


def policy_forward(state, params, *, n_actions, batch_block=128):
    """Fused SAC policy MLP forward pass.

    state:  (B, input_dims) float32
    params: dict from pack_params(): bf16 weights w1 (D,H1), w2 (H1,H2),
            whead (H2,P) [P = 2A padded to a multiple of 128], f32 biases
            b1 (1,H1), b2 (1,H2), bhead (1,P), clamp vectors lo/hi (1,P).
    n_actions: static Python int (NOT a traced value).
    returns: (mu, log_std), each (B, A) float32
    """
    B, D = state.shape
    A = int(n_actions)
    H1 = params["w1"].shape[1]
    H2 = params["w2"].shape[1]
    P = params["whead"].shape[1]

    # Batch tiling: single step for tiny B; otherwise at least 2 grid steps so
    # both v7x TensorCores get work, capped at batch_block rows per step.
    if B <= 8:
        tb = B
    else:
        tb = min(batch_block, max(8, _round_up(-(-B // 2), 8)))
    B_pad = _round_up(B, tb)
    x = state
    if B_pad != B:
        x = jnp.pad(state, ((0, B_pad - B), (0, 0)))
    grid = (B_pad // tb,)

    in_specs = [
        pl.BlockSpec((tb, D), lambda i: (i, 0)),        # state rows
        _resident_spec((D, H1)), _resident_spec((1, H1)),   # fc1
        _resident_spec((H1, H2)), _resident_spec((1, H2)),  # fc2
        _resident_spec((H2, P)), _resident_spec((1, P)),    # fused heads
        _resident_spec((1, P)), _resident_spec((1, P)),     # clamp lo / hi
    ]
    out_spec = pl.BlockSpec((tb, P), lambda i: (i, 0))

    flops = 2 * B_pad * (D * H1 + H1 * H2 + H2 * P)
    bytes_accessed = (
        x.size * 4
        + params["w1"].size * 2 + params["w2"].size * 2 + params["whead"].size * 2
        + params["b1"].size * 4 + params["b2"].size * 4 + params["bhead"].size * 4
        + params["lo"].size * 4 + params["hi"].size * 4
        + B_pad * P * 4)

    out = pl.pallas_call(
        _policy_kernel,
        out_shape=jax.ShapeDtypeStruct((B_pad, P), jnp.float32),
        grid=grid,
        in_specs=in_specs,
        out_specs=out_spec,
        compiler_params=pltpu.CompilerParams(
            dimension_semantics=("parallel",),
            vmem_limit_bytes=32 * 1024 * 1024),
        cost_estimate=pl.CostEstimate(flops=flops, transcendentals=0,
                                      bytes_accessed=bytes_accessed),
    )(x,
      params["w1"], params["b1"],
      params["w2"], params["b2"],
      params["whead"], params["bhead"],
      params["lo"], params["hi"])

    mu = out[:B, :A]
    log_std = out[:B, A:2 * A]
    return mu, log_std


def init_params_f32(key, input_dims, n_actions, fc1_dims=256, fc2_dims=256):
    """Deterministic f32 init mimicking nn.Linear's U(-1/sqrt(fan_in), +1/sqrt(fan_in))."""
    def linear(k, fan_in, fan_out):
        kw, kb = jax.random.split(k)
        bound = 1.0 / jnp.sqrt(jnp.float32(fan_in))
        w = jax.random.uniform(kw, (fan_in, fan_out), jnp.float32, -bound, bound)
        b = jax.random.uniform(kb, (1, fan_out), jnp.float32, -bound, bound)
        return w, b

    k1, k2, k3, k4 = jax.random.split(key, 4)
    w1, b1 = linear(k1, input_dims, fc1_dims)
    w2, b2 = linear(k2, fc1_dims, fc2_dims)
    wmu, bmu = linear(k3, fc2_dims, n_actions)
    wls, bls = linear(k4, fc2_dims, n_actions)
    return {"w1": w1, "b1": b1, "w2": w2, "b2": b2,
            "wmu": wmu, "bmu": bmu, "wls": wls, "bls": bls,
            "n_actions": n_actions}


def pack_params(raw, *, log_std_min=-20.0, log_std_max=2.0):
    """Cast weights to bf16, build the lane-dense (128-padded) fused head,
    and precompute per-column clamp vectors (only log_std columns clamped)."""
    A = int(raw["n_actions"])          # plain Python int here (not traced)
    H2 = raw["w2"].shape[1]
    P = max(128, _round_up(2 * A, 128))

    whead = jnp.zeros((H2, P), jnp.float32)
    whead = whead.at[:, :A].set(raw["wmu"]).at[:, A:2 * A].set(raw["wls"])
    bhead = jnp.zeros((1, P), jnp.float32)
    bhead = bhead.at[:, :A].set(raw["bmu"]).at[:, A:2 * A].set(raw["bls"])

    lo = jnp.full((1, P), -jnp.inf, jnp.float32).at[:, A:2 * A].set(float(log_std_min))
    hi = jnp.full((1, P), jnp.inf, jnp.float32).at[:, A:2 * A].set(float(log_std_max))

    return {
        "w1": raw["w1"].astype(jnp.bfloat16), "b1": raw["b1"],
        "w2": raw["w2"].astype(jnp.bfloat16), "b2": raw["b2"],
        "whead": whead.astype(jnp.bfloat16), "bhead": bhead,
        "lo": lo, "hi": hi,
    }


if __name__ == "__main__":
    key = jax.random.PRNGKey(0)
    k_params, k_state = jax.random.split(key)

    batch = 8
    input_dims = 16
    n_actions = 4

    raw = init_params_f32(k_params, input_dims, n_actions)
    params = pack_params(raw)
    state = jax.random.normal(k_state, (batch, input_dims), jnp.float32)

    # n_actions is static (baked into the jitted callable), params is a pure
    # array pytree -> no concretization of traced values inside the wrapper.
    fwd = jax.jit(functools.partial(policy_forward, n_actions=n_actions))
    mu, log_std = fwd(state, params)
    jax.block_until_ready((mu, log_std))

    # Reference 1: same bf16 weight/activation casts, f32 accumulation (tight).
    bf = jnp.bfloat16
    h1 = jnp.maximum(jnp.dot(state.astype(bf), raw["w1"].astype(bf),
                             preferred_element_type=jnp.float32) + raw["b1"],
                     0.0).astype(bf)
    h2 = jnp.maximum(jnp.dot(h1, raw["w2"].astype(bf),
                             preferred_element_type=jnp.float32) + raw["b2"],
                     0.0).astype(bf)
    mu_ref = jnp.dot(h2, raw["wmu"].astype(bf),
                     preferred_element_type=jnp.float32) + raw["bmu"]
    ls_ref = jnp.clip(jnp.dot(h2, raw["wls"].astype(bf),
                              preferred_element_type=jnp.float32) + raw["bls"],
                      -20.0, 2.0)

    # Reference 2: full f32 forward (loose tolerance — bf16 rounding).
    h1f = jnp.maximum(state @ raw["w1"] + raw["b1"], 0.0)
    h2f = jnp.maximum(h1f @ raw["w2"] + raw["b2"], 0.0)
    mu_f32 = h2f @ raw["wmu"] + raw["bmu"]
    ls_f32 = jnp.clip(h2f @ raw["wls"] + raw["bls"], -20.0, 2.0)

    assert mu.shape == (batch, n_actions) and log_std.shape == (batch, n_actions)
    assert jnp.allclose(mu, mu_ref, atol=1e-4, rtol=1e-4)
    assert jnp.allclose(log_std, ls_ref, atol=1e-4, rtol=1e-4)
    assert jnp.allclose(mu, mu_f32, atol=5e-2, rtol=5e-2)
    assert jnp.allclose(log_std, ls_f32, atol=5e-2, rtol=5e-2)
    assert bool(jnp.all(log_std >= -20.0)) and bool(jnp.all(log_std <= 2.0))

    print("KERNEL_OK")
</pallas_src>

<mosaic_0001>
module attributes {stable_mosaic.version = 11 : i64} {
  func.func @_policy_kernel(%arg0: i32, %arg1: memref<8x16xf32, #tpu.memory_space<vmem>>, %arg2: memref<16x256xbf16, #tpu.memory_space<vmem>>, %arg3: memref<1x256xf32, #tpu.memory_space<vmem>>, %arg4: memref<256x256xbf16, #tpu.memory_space<vmem>>, %arg5: memref<1x256xf32, #tpu.memory_space<vmem>>, %arg6: memref<256x128xbf16, #tpu.memory_space<vmem>>, %arg7: memref<1x128xf32, #tpu.memory_space<vmem>>, %arg8: memref<1x128xf32, #tpu.memory_space<vmem>>, %arg9: memref<1x128xf32, #tpu.memory_space<vmem>>, %arg10: memref<8x128xf32, #tpu.memory_space<vmem>>) attributes {dimension_semantics = [#tpu.dimension_semantics<parallel>], iteration_bounds = array<i64: 1>, scalar_prefetch = 0 : i64, scratch_operands = 0 : i64, tpu.core_type = #tpu.core_type<tc>, window_params = [{transform_indices = @transform_0, window_bounds = array<i64: 8, 16>}, {pipeline_mode = #tpu.pipeline_mode<synchronous>, transform_indices = @transform_1, window_bounds = array<i64: 16, 256>}, {pipeline_mode = #tpu.pipeline_mode<synchronous>, transform_indices = @transform_2, window_bounds = array<i64: 1, 256>}, {pipeline_mode = #tpu.pipeline_mode<synchronous>, transform_indices = @transform_3, window_bounds = array<i64: 256, 256>}, {pipeline_mode = #tpu.pipeline_mode<synchronous>, transform_indices = @transform_4, window_bounds = array<i64: 1, 256>}, {pipeline_mode = #tpu.pipeline_mode<synchronous>, transform_indices = @transform_5, window_bounds = array<i64: 256, 128>}, {pipeline_mode = #tpu.pipeline_mode<synchronous>, transform_indices = @transform_6, window_bounds = array<i64: 1, 128>}, {pipeline_mode = #tpu.pipeline_mode<synchronous>, transform_indices = @transform_7, window_bounds = array<i64: 1, 128>}, {pipeline_mode = #tpu.pipeline_mode<synchronous>, transform_indices = @transform_8, window_bounds = array<i64: 1, 128>}, {transform_indices = @transform_9, window_bounds = array<i64: 8, 128>}]} {
    %c0 = arith.constant 0 : index
    %c0_0 = arith.constant 0 : index
    %0 = vector.load %arg1[%c0, %c0_0] : memref<8x16xf32, #tpu.memory_space<vmem>>, vector<8x16xf32>
    %1 = arith.truncf %0 : vector<8x16xf32> to vector<8x16xbf16>
    %c0_1 = arith.constant 0 : index
    %c0_2 = arith.constant 0 : index
    %2 = vector.load %arg2[%c0_1, %c0_2] : memref<16x256xbf16, #tpu.memory_space<vmem>>, vector<16x256xbf16>
    %cst = arith.constant dense<0.000000e+00> : vector<8x256xf32>
    %3 = tpu.matmul %1, %2, %cst {dimension_numbers = #tpu.dot_dimension_numbers<[1], [0], [0], [1], [0, 0, 1, 1], [], []>} : vector<8x16xbf16>, vector<16x256xbf16>, vector<8x256xf32> -> vector<8x256xf32>
    %c0_3 = arith.constant 0 : index
    %c0_4 = arith.constant 0 : index
    %4 = vector.load %arg3[%c0_3, %c0_4] : memref<1x256xf32, #tpu.memory_space<vmem>>, vector<1x256xf32>
    %5 = vector.broadcast %4 : vector<1x256xf32> to vector<8x256xf32>
    %6 = arith.addf %3, %5 : vector<8x256xf32>
    %cst_5 = arith.constant 0.000000e+00 : f32
    %7 = vector.broadcast %cst_5 : f32 to vector<8x256xf32>
    %8 = arith.maximumf %6, %7 : vector<8x256xf32>
    %9 = arith.truncf %8 : vector<8x256xf32> to vector<8x256xbf16>
    %c0_6 = arith.constant 0 : index
    %c0_7 = arith.constant 0 : index
    %10 = vector.load %arg4[%c0_6, %c0_7] : memref<256x256xbf16, #tpu.memory_space<vmem>>, vector<256x256xbf16>
    %cst_8 = arith.constant dense<0.000000e+00> : vector<8x256xf32>
    %11 = tpu.matmul %9, %10, %cst_8 {dimension_numbers = #tpu.dot_dimension_numbers<[1], [0], [0], [1], [0, 0, 1, 1], [], []>} : vector<8x256xbf16>, vector<256x256xbf16>, vector<8x256xf32> -> vector<8x256xf32>
    %c0_9 = arith.constant 0 : index
    %c0_10 = arith.constant 0 : index
    %12 = vector.load %arg5[%c0_9, %c0_10] : memref<1x256xf32, #tpu.memory_space<vmem>>, vector<1x256xf32>
    %13 = vector.broadcast %12 : vector<1x256xf32> to vector<8x256xf32>
    %14 = arith.addf %11, %13 : vector<8x256xf32>
    %cst_11 = arith.constant 0.000000e+00 : f32
    %15 = vector.broadcast %cst_11 : f32 to vector<8x256xf32>
    %16 = arith.maximumf %14, %15 : vector<8x256xf32>
    %17 = arith.truncf %16 : vector<8x256xf32> to vector<8x256xbf16>
    %c0_12 = arith.constant 0 : index
    %c0_13 = arith.constant 0 : index
    %18 = vector.load %arg6[%c0_12, %c0_13] : memref<256x128xbf16, #tpu.memory_space<vmem>>, vector<256x128xbf16>
    %cst_14 = arith.constant dense<0.000000e+00> : vector<8x128xf32>
    %19 = tpu.matmul %17, %18, %cst_14 {dimension_numbers = #tpu.dot_dimension_numbers<[1], [0], [0], [1], [0, 0, 1, 1], [], []>} : vector<8x256xbf16>, vector<256x128xbf16>, vector<8x128xf32> -> vector<8x128xf32>
    %c0_15 = arith.constant 0 : index
    %c0_16 = arith.constant 0 : index
    %20 = vector.load %arg7[%c0_15, %c0_16] : memref<1x128xf32, #tpu.memory_space<vmem>>, vector<1x128xf32>
    %21 = vector.broadcast %20 : vector<1x128xf32> to vector<8x128xf32>
    %22 = arith.addf %19, %21 : vector<8x128xf32>
    %c0_17 = arith.constant 0 : index
    %c0_18 = arith.constant 0 : index
    %23 = vector.load %arg8[%c0_17, %c0_18] : memref<1x128xf32, #tpu.memory_space<vmem>>, vector<1x128xf32>
    %24 = vector.broadcast %23 : vector<1x128xf32> to vector<8x128xf32>
    %25 = arith.maximumf %22, %24 : vector<8x128xf32>
    %c0_19 = arith.constant 0 : index
    %c0_20 = arith.constant 0 : index
    %26 = vector.load %arg9[%c0_19, %c0_20] : memref<1x128xf32, #tpu.memory_space<vmem>>, vector<1x128xf32>
    %27 = vector.broadcast %26 : vector<1x128xf32> to vector<8x128xf32>
    %28 = arith.minimumf %25, %27 : vector<8x128xf32>
    %c0_21 = arith.constant 0 : index
    %c0_22 = arith.constant 0 : index
    %29 = vector.load %arg10[%c0_21, %c0_22] : memref<8x128xf32, #tpu.memory_space<vmem>>, vector<8x128xf32>
    tpu.vector_store %arg10[%c0_21, %c0_22], %28 {strides = array<i32>} : memref<8x128xf32, #tpu.memory_space<vmem>>, vector<8x128xf32>,
    return
  }
  func.func @transform_0(%arg0: i32) -> (i32, i32) {
    %c0_i32 = arith.constant 0 : i32
    %c0_i32_0 = arith.constant 0 : i32
    return %arg0, %c0_i32 : i32, i32
  }
  func.func @transform_1(%arg0: i32) -> (i32, i32) {
    %c0_i32 = arith.constant 0 : i32
    %c0_i32_0 = arith.constant 0 : i32
    %c0_i32_1 = arith.constant 0 : i32
    return %c0_i32, %c0_i32_0 : i32, i32
  }
  func.func @transform_2(%arg0: i32) -> (i32, i32) {
    %c0_i32 = arith.constant 0 : i32
    %c0_i32_0 = arith.constant 0 : i32
    %c0_i32_1 = arith.constant 0 : i32
    return %c0_i32, %c0_i32_0 : i32, i32
  }
  func.func @transform_3(%arg0: i32) -> (i32, i32) {
    %c0_i32 = arith.constant 0 : i32
    %c0_i32_0 = arith.constant 0 : i32
    %c0_i32_1 = arith.constant 0 : i32
    return %c0_i32, %c0_i32_0 : i32, i32
  }
  func.func @transform_4(%arg0: i32) -> (i32, i32) {
    %c0_i32 = arith.constant 0 : i32
    %c0_i32_0 = arith.constant 0 : i32
    %c0_i32_1 = arith.constant 0 : i32
    return %c0_i32, %c0_i32_0 : i32, i32
  }
  func.func @transform_5(%arg0: i32) -> (i32, i32) {
    %c0_i32 = arith.constant 0 : i32
    %c0_i32_0 = arith.constant 0 : i32
    %c0_i32_1 = arith.constant 0 : i32
    return %c0_i32, %c0_i32_0 : i32, i32
  }
  func.func @transform_6(%arg0: i32) -> (i32, i32) {
    %c0_i32 = arith.constant 0 : i32
    %c0_i32_0 = arith.constant 0 : i32
    %c0_i32_1 = arith.constant 0 : i32
    return %c0_i32, %c0_i32_0 : i32, i32
  }
  func.func @transform_7(%arg0: i32) -> (i32, i32) {
    %c0_i32 = arith.constant 0 : i32
    %c0_i32_0 = arith.constant 0 : i32
    %c0_i32_1 = arith.constant 0 : i32
    return %c0_i32, %c0_i32_0 : i32, i32
  }
  func.func @transform_8(%arg0: i32) -> (i32, i32) {
    %c0_i32 = arith.constant 0 : i32
    %c0_i32_0 = arith.constant 0 : i32
    %c0_i32_1 = arith.constant 0 : i32
    return %c0_i32, %c0_i32_0 : i32, i32
  }
  func.func @transform_9(%arg0: i32) -> (i32, i32) {
    %c0_i32 = arith.constant 0 : i32
    %c0_i32_0 = arith.constant 0 : i32
    return %arg0, %c0_i32 : i32, i32
  }
}

</mosaic_0001>

<bundles_post_ra>
// kernel: policy_forward.1
= control target key start
LH: loop header
LB: loop body
LE: loop exit
PB: predicated region body
PF: predicated region fallthrough
CT: control target
= control target key end

     0   :  { %14 = vsyncpa [#allocation3], 0  ;;  %s1115_s0 = inlined_call_operand.hbm [shape: f32[8,16], index: 0, kind: input, shape index: {}]   ;;  %s1116_s1 = inlined_call_operand.hbm [shape: bf16[16,256], index: 1, kind: input, shape index: {}]   ;;  %s1117_s2 = inlined_call_operand.hbm [shape: f32[1,256], index: 2, kind: input, shape index: {}]   ;;  %s1118_s3 = inlined_call_operand.hbm [shape: bf16[256,256], index: 3, kind: input, shape index: {}]   ;;  %s1119_s4 = inlined_call_operand.hbm [shape: f32[1,256], index: 4, kind: input, shape index: {}]   ;;  %s1120_s5 = inlined_call_operand.hbm [shape: bf16[256,128], index: 5, kind: input, shape index: {}]   ;;  %s1121_s6 = inlined_call_operand.vmem [shape: f32[1,128], index: 6, kind: input, shape index: {}]   ;;  %s1122_s7 = inlined_call_operand.vmem [shape: f32[1,128], index: 7, kind: input, shape index: {}]   ;;  %s1123_s8 = inlined_call_operand.vmem [shape: f32[1,128], index: 8, kind: input, shape index: {}]   ;;  %s1124_s9 = inlined_call_operand.vmem [shape: f32[8,128], index: 9, kind: output, shape index: {}]  }
   0x1   :  { %15 = vsyncpa [#allocation5], 0 }
   0x2   :  { %16 = vsyncpa [#allocation8], 0  ;;  %s33_s11 = sshll.u32 %s1116_s1, 4  ;;  %s34_s11 = int_to_ptr.hbm [resolvable:$true] %s33_s11 }
   0x3   :  { %17 = vsyncpa [#allocation11], 0  ;;  %s1023_s12 = smov [#allocation4]   ;;  %s57_s16 = sshll.u32 %s1118_s3, 4  ;;  %s58_s16 = int_to_ptr.hbm [resolvable:$true] %s57_s16 }
   0x4   :  { %s35_s13 = sshll.u32 %s1023_s12, 4  ;;  %s1024_s17 = smov 128   ;;  %s36_s13 = int_to_ptr.vmem [resolvable:$true] %s35_s13 }
   0x5   :  { %s1025_s18 = smov 8   ;;  %s1026_s19 = smov [#allocation7]  }
   0x6   :  { %41 = dma.hbm_to_vmem [thread:$0]  %s34_s11, 256, %s36_s13, [#allocation5], %s1024_s17, %s1024_s17, %s1025_s18  }
   0x7   :  { %s59_s20 = sshll.u32 %s1026_s19, 4  ;;  %s23_s23 = sshll.u32 %s1115_s0, 4  ;;  %s60_s20 = int_to_ptr.vmem [resolvable:$true] %s59_s20  ;;  %s24_s23 = int_to_ptr.hbm [resolvable:$true] %s23_s23 }
   0x8   :  { %65 = dma.hbm_to_vmem [thread:$0]  %s58_s16, 4096, %s60_s20, [#allocation8], %s1024_s17, %s1024_s17, %s1025_s18  }
   0x9   :  { %s47_s25 = sshll.u32 %s1117_s2, 4  ;;  %s1027_s26 = smov [#allocation2]   ;;  %s48_s25 = int_to_ptr.hbm [resolvable:$true] %s47_s25 }
   0xa   :  { %s25_s27 = sshll.u32 %s1027_s26, 4  ;;  %s1028_s3 = smov [#allocation6]   ;;  %s26_s27 = int_to_ptr.vmem [resolvable:$true] %s25_s27 }
   0xb   :  { %28 = dma.hbm_to_vmem [thread:$0]  %s24_s23, 128, %s26_s27, [#allocation3]  }
   0xc   :  { %s49_s28 = sshll.u32 %s1028_s3, 4  ;;  %s71_s10 = sshll.u32 %s1119_s4, 4  ;;  %s50_s28 = int_to_ptr.vmem [resolvable:$true] %s49_s28  ;;  %s72_s10 = int_to_ptr.hbm [resolvable:$true] %s71_s10 }
   0xd   :  { %52 = dma.hbm_to_vmem [thread:$0]  %s48_s25, 32, %s50_s28, [#allocation5]  }
   0xe   :  { %s81_s12 = sshll.u32 %s1120_s5, 4  ;;  %s1029_s13 = smov [#allocation9]   ;;  %s82_s12 = int_to_ptr.hbm [resolvable:$true] %s81_s12 }
   0xf   :  { %s73_s2 = sshll.u32 %s1029_s13, 4  ;;  %s1030_s14 = smov [#allocation10]   ;;  %s74_s2 = int_to_ptr.vmem [resolvable:$true] %s73_s2 }
  0x10   :  { %76 = dma.hbm_to_vmem [thread:$0]  %s72_s10, 32, %s74_s2, [#allocation8]  }
  0x11   :  { %s83_s15 = sshll.u32 %s1030_s14, 4  ;;  %s1031_s16 = smov 64   ;;  %s84_s15 = int_to_ptr.vmem [resolvable:$true] %s83_s15 }
  0x12   :  { %s1032_s17 = smov 4  }
  0x13   :  { %89 = dma.hbm_to_vmem [thread:$0]  %s82_s12, 2048, %s84_s15, [#allocation11], %s1031_s16, %s1031_s16, %s1032_s17  }
  0x14   :  { %1015 = dma.done.wait [#allocation3], 128  }
  0x15   :  { %1016 = vsyncadd [#allocation3], 4294967168 }
  0x16   :  { %1017 = dma.done.wait [#allocation5], 288  }
  0x17   :  { %1018 = vsyncadd [#allocation5], 4294967008 }
  0x18   :  { %1019 = dma.done.wait [#allocation8], 4128  }
  0x19   :  { %1020 = vsyncadd [#allocation8], 4294963168 }
  0x1a   :  { %1021 = dma.done.wait [#allocation11], 2048  }
  0x1b   :  { %1022 = vsyncadd [#allocation11], 4294965248  ;;  %v608_v0 = vld [vmem:[#allocation4] sm:$0xf]  ;;  %v809_v1 = vld [vmem:[#allocation4 + $0x4] sm:$0xf0] }
  0x1c   :  { %v808_v2 = vld [vmem:[#allocation4 + $0x4] sm:$0xf]  ;;  %v609_v3 = vor.u32 %v809_v1, %v608_v0  ;;  %v610_v4 = vld [vmem:[#allocation4 + $0x8] sm:$0xf0]  ;;  %v121_v5 = vld [vmem:[#allocation2] sm:$0xff]  ;;  %vm141_vm0 = vcmask 130048  }
  0x1d   :  { %v674_v6 = vld [vmem:[#allocation7 + $0x70] sm:$0xf]  ;;  %v613_v7 = vor.u32 %v808_v2, %v610_v4  ;;  %v122_v8 = vpack.c.bf16 %v121_v5, %v121_v5  ;;  %v825_v9 = vld [vmem:[#allocation7 + $0x74] sm:$0xf0]  ;;  %v824_v14 = vld [vmem:[#allocation7 + $0x74] sm:$0xf] }
  0x1e   :  { %v738_v10 = vld [vmem:[#allocation7 + $0xf0] sm:$0xf]  ;;  %v841_v11 = vld [vmem:[#allocation7 + $0xf4] sm:$0xf0]  ;;  %152 = vmatpush.bf16.msra.mxu0 %v609_v3  ;;  %v675_v12 = vor.u32 %v825_v9, %v674_v6  ;;  %v676_v15 = vld [vmem:[#allocation7 + $0x78] sm:$0xf0] }
  0x1f   :  { %v739_v13 = vor.u32 %v841_v11, %v738_v10  ;;  %v840_v16 = vld [vmem:[#allocation7 + $0xf4] sm:$0xf]  ;;  %165 = vmatpush.bf16.msra.mxu1 %v613_v7  ;;  %v679_v17 = vor.u32 %v824_v14, %v676_v15  ;;  %v740_v18 = vld [vmem:[#allocation7 + $0xf8] sm:$0xf0]  ;;  %v666_v19 = vld [vmem:[#allocation7 + $0x60] sm:$0xf] }
  0x20   :  { %v823_v20 = vld [vmem:[#allocation7 + $0x64] sm:$0xf0]  ;;  %373 = vmatpush.bf16.msra.mxu2 %v675_v12  ;;  %v743_v21 = vor.u32 %v840_v16, %v740_v18  ;;  %v730_v23 = vld [vmem:[#allocation7 + $0xe0] sm:$0xf]  ;;  %v822_v25 = vld [vmem:[#allocation7 + $0x64] sm:$0xf] }
  0x21   :  { %386 = vmatpush.bf16.msra.mxu3 %v739_v13  ;;  %v667_v22 = vor.u32 %v823_v20, %v666_v19  ;;  %v839_v24 = vld [vmem:[#allocation7 + $0xe4] sm:$0xf0]  ;;  %614 = vmatmul.msk.bf16.vlgmr.msra.gmra.mxu0 %vm141_vm0, %v122_v8  ;;  %v668_v27 = vld [vmem:[#allocation7 + $0x68] sm:$0xf0]  ;;  %v838_v28 = vld [vmem:[#allocation7 + $0xe4] sm:$0xf] }
  0x22   :  { %v731_v26 = vor.u32 %v839_v24, %v730_v23  ;;  %v732_v29 = vld [vmem:[#allocation7 + $0xe8] sm:$0xf0]  ;;  %615 = vmatmul.msk.bf16.vlgmr.msra.gmra.mxu1 %vm141_vm0, %v122_v8  ;;  %399 = vmatpush.bf16.msrb.mxu0 %v679_v17  ;;  %v671_v30 = vor.u32 %v822_v25, %v668_v27  ;;  %v658_v31 = vld [vmem:[#allocation7 + $0x50] sm:$0xf]  ;;  %v821_v32 = vld [vmem:[#allocation7 + $0x54] sm:$0xf0] }
  0x23   :  { %v722_v33 = vld [vmem:[#allocation7 + $0xd0] sm:$0xf]  ;;  %412 = vmatpush.bf16.msrb.mxu1 %v743_v21  ;;  %v735_v34 = vor.u32 %v838_v28, %v732_v29  ;;  %v837_v35 = vld [vmem:[#allocation7 + $0xd4] sm:$0xf0]  ;;  %v820_v36 = vld [vmem:[#allocation7 + $0x54] sm:$0xf]  ;;  %v659_v38 = vor.u32 %v821_v32, %v658_v31 }
  0x24   :  { %v660_v37 = vld [vmem:[#allocation7 + $0x58] sm:$0xf0]  ;;  %374 = vmatpush.bf16.msra.mxu2 %v667_v22  ;;  %v723_v39 = vor.u32 %v837_v35, %v722_v33  ;;  %v836_v40 = vld [vmem:[#allocation7 + $0xd4] sm:$0xf]  ;;  %v650_v42 = vld [vmem:[#allocation7 + $0x40] sm:$0xf] }
  0x25   :  { %387 = vmatpush.bf16.msra.mxu3 %v731_v26  ;;  %v724_v41 = vld [vmem:[#allocation7 + $0xd8] sm:$0xf0]  ;;  %v819_v43 = vld [vmem:[#allocation7 + $0x44] sm:$0xf0]  ;;  %v714_v44 = vld [vmem:[#allocation7 + $0xc0] sm:$0xf]  ;;  %v663_v46 = vor.u32 %v820_v36, %v660_v37 }
  0x26   :  { %v835_v45 = vld [vmem:[#allocation7 + $0xc4] sm:$0xf0]  ;;  %400 = vmatpush.bf16.msrb.mxu0 %v671_v30  ;;  %v727_v47 = vor.u32 %v836_v40, %v724_v41  ;;  %v818_v48 = vld [vmem:[#allocation7 + $0x44] sm:$0xf]  ;;  %v652_v49 = vld [vmem:[#allocation7 + $0x48] sm:$0xf0]  ;;  %v651_v50 = vor.u32 %v819_v43, %v650_v42 }
  0x27   :  { %413 = vmatpush.bf16.msrb.mxu1 %v735_v34  ;;  %v715_v51 = vor.u32 %v835_v45, %v714_v44  ;;  %v834_v52 = vld [vmem:[#allocation7 + $0xc4] sm:$0xf]  ;;  %v716_v53 = vld [vmem:[#allocation7 + $0xc8] sm:$0xf0]  ;;  %v642_v54 = vld [vmem:[#allocation7 + $0x30] sm:$0xf]  ;;  %v655_v58 = vor.u32 %v818_v48, %v652_v49 }
  0x28   :  { %375 = vmatpush.bf16.msra.mxu2 %v659_v38  ;;  %v817_v55 = vld [vmem:[#allocation7 + $0x34] sm:$0xf0]  ;;  %v706_v56 = vld [vmem:[#allocation7 + $0xb0] sm:$0xf]  ;;  %v816_v59 = vld [vmem:[#allocation7 + $0x34] sm:$0xf]  ;;  %v719_v60 = vor.u32 %v834_v52, %v716_v53 }
  0x29   :  { %388 = vmatpush.bf16.msra.mxu3 %v723_v39  ;;  %v833_v57 = vld [vmem:[#allocation7 + $0xb4] sm:$0xf0]  ;;  %v644_v61 = vld [vmem:[#allocation7 + $0x38] sm:$0xf0]  ;;  %v832_v62 = vld [vmem:[#allocation7 + $0xb4] sm:$0xf]  ;;  %v643_v0 = vor.u32 %v817_v55, %v642_v54 }
  0x2a   :  { %401 = vmatpush.bf16.msrb.mxu0 %v663_v46  ;;  %v708_v63 = vld [vmem:[#allocation7 + $0xb8] sm:$0xf0]  ;;  %v707_v1 = vor.u32 %v833_v57, %v706_v56  ;;  %v634_v2 = vld [vmem:[#allocation7 + $0x20] sm:$0xf]  ;;  %v815_v3 = vld [vmem:[#allocation7 + $0x24] sm:$0xf0]  ;;  %v647_v6 = vor.u32 %v816_v59, %v644_v61 }
  0x2b   :  { %414 = vmatpush.bf16.msrb.mxu1 %v727_v47  ;;  %v698_v4 = vld [vmem:[#allocation7 + $0xa0] sm:$0xf]  ;;  %v831_v5 = vld [vmem:[#allocation7 + $0xa4] sm:$0xf0]  ;;  %v711_v7 = vor.u32 %v832_v62, %v708_v63  ;;  %v814_v8 = vld [vmem:[#allocation7 + $0x24] sm:$0xf]  ;;  %v635_v10 = vor.u32 %v815_v3, %v634_v2 }
  0x2c   :  { %376 = vmatpush.bf16.msra.mxu2 %v651_v50  ;;  %v636_v9 = vld [vmem:[#allocation7 + $0x28] sm:$0xf0]  ;;  %v699_v11 = vor.u32 %v831_v5, %v698_v4  ;;  %v830_v12 = vld [vmem:[#allocation7 + $0xa4] sm:$0xf]  ;;  %v626_v16 = vld [vmem:[#allocation7 + $0x10] sm:$0xf] }
  0x2d   :  { %389 = vmatpush.bf16.msra.mxu3 %v715_v51  ;;  %v700_v13 = vld [vmem:[#allocation7 + $0xa8] sm:$0xf0]  ;;  %v639_v14 = vor.u32 %v814_v8, %v636_v9  ;;  %v813_v17 = vld [vmem:[#allocation7 + $0x14] sm:$0xf0]  ;;  %v690_v18 = vld [vmem:[#allocation7 + $0x90] sm:$0xf] }
  0x2e   :  { %402 = vmatpush.bf16.msrb.mxu0 %v655_v58  ;;  %v703_v15 = vor.u32 %v830_v12, %v700_v13  ;;  %v627_v19 = vor.u32 %v813_v17, %v626_v16  ;;  %v829_v20 = vld [vmem:[#allocation7 + $0x94] sm:$0xf0]  ;;  %v812_v21 = vld [vmem:[#allocation7 + $0x14] sm:$0xf]  ;;  %v628_v22 = vld [vmem:[#allocation7 + $0x18] sm:$0xf0] }
  0x2f   :  { %415 = vmatpush.bf16.msrb.mxu1 %v719_v60  ;;  %v691_v23 = vor.u32 %v829_v20, %v690_v18  ;;  %v631_v24 = vor.u32 %v812_v21, %v628_v22  ;;  %v828_v25 = vld [vmem:[#allocation7 + $0x94] sm:$0xf]  ;;  %v692_v26 = vld [vmem:[#allocation7 + $0x98] sm:$0xf0]  ;;  %v618_v28 = vld [vmem:[#allocation7] sm:$0xf] }
  0x30   :  { %377 = vmatpush.bf16.msra.mxu2 %v643_v0  ;;  %v695_v27 = vor.u32 %v828_v25, %v692_v26  ;;  %v811_v29 = vld [vmem:[#allocation7 + $0x4] sm:$0xf0]  ;;  %v682_v30 = vld [vmem:[#allocation7 + $0x80] sm:$0xf]  ;;  %v810_v33 = vld [vmem:[#allocation7 + $0x4] sm:$0xf] }
  0x31   :  { %390 = vmatpush.bf16.msra.mxu3 %v707_v1  ;;  %v619_v31 = vor.u32 %v811_v29, %v618_v28  ;;  %v827_v32 = vld [vmem:[#allocation7 + $0x84] sm:$0xf0]  ;;  %v620_v34 = vld [vmem:[#allocation7 + $0x8] sm:$0xf0]  ;;  %v826_v37 = vld [vmem:[#allocation7 + $0x84] sm:$0xf] }
  0x32   :  { %403 = vmatpush.bf16.msrb.mxu0 %v647_v6  ;;  %v683_v35 = vor.u32 %v827_v32, %v682_v30  ;;  %v623_v36 = vor.u32 %v810_v33, %v620_v34  ;;  %v684_v38 = vld [vmem:[#allocation7 + $0x88] sm:$0xf0]  ;;  %v857_v40 = vld [vmem:[#allocation10 + $0x78] sm:$0xff]  ;;  %v856_v42 = vld [vmem:[#allocation10 + $0x70] sm:$0xff] }
  0x33   :  { %416 = vmatpush.bf16.msrb.mxu1 %v711_v7  ;;  %v687_v39 = vor.u32 %v826_v37, %v684_v38  ;;  %v849_v41 = vld [vmem:[#allocation10 + $0x38] sm:$0xff]  ;;  %v848_v43 = vld [vmem:[#allocation10 + $0x30] sm:$0xff]  ;;  %v855_v44 = vld [vmem:[#allocation10 + $0x68] sm:$0xff] }
  0x34   :  { %378 = vmatpush.bf16.msra.mxu2 %v635_v10  ;;  %v847_v45 = vld [vmem:[#allocation10 + $0x28] sm:$0xff]  ;;  %v854_v46 = vld [vmem:[#allocation10 + $0x60] sm:$0xff]  ;;  %v853_v48 = vld [vmem:[#allocation10 + $0x58] sm:$0xff] }
  0x35   :  { %391 = vmatpush.bf16.msra.mxu3 %v699_v11  ;;  %v846_v47 = vld [vmem:[#allocation10 + $0x20] sm:$0xff]  ;;  %v125_v49 = vld [vmem:[#allocation6] sm:$0x3]  ;;  %v852_v50 = vld [vmem:[#allocation10 + $0x50] sm:$0xff] }
  0x36   :  { %404 = vmatpush.bf16.msrb.mxu0 %v639_v14  ;;  %v127_v51 = vperm.slane %v125_v49, 0  ;;  %v128_v52 = vperm.slane %v125_v49, 1  ;;  %v845_v63 = vld [vmem:[#allocation10 + $0x18] sm:$0xff]  ;;  %v851_v0 = vld [vmem:[#allocation10 + $0x48] sm:$0xff]  ;;  %v844_v1 = vld [vmem:[#allocation10 + $0x10] sm:$0xff] }
  0x37   :  { %417 = vmatpush.bf16.msrb.mxu1 %v703_v15  ;;  %v850_v2 = vld [vmem:[#allocation10 + $0x40] sm:$0xff]  ;;  %v843_v3 = vld [vmem:[#allocation10 + $0x8] sm:$0xff]  ;;  %v207_v5 = vld [vmem:[#allocation9] sm:$0x3] }
  0x38   :  { %379 = vmatpush.bf16.msra.mxu2 %v627_v19  ;;  %v842_v4 = vld [vmem:[#allocation10] sm:$0xff]  ;;  %v210_v6 = vperm.slane %v207_v5, 1  ;;  %v209_v11 = vperm.slane %v207_v5, 0 }
  0x39   :  { %392 = vmatpush.bf16.msra.mxu3 %v691_v23  ;;  %v868_v25 = vld [vmem:[%s1121_s6] ss:$0 sm:$0xff] }
  0x3a   :  { %405 = vmatpush.bf16.msrb.mxu0 %v631_v24  ;;  %v869_v28 = vld [vmem:[%s1122_s7] ss:$0 sm:$0xff] }
  0x3b   :  { %418 = vmatpush.bf16.msrb.mxu1 %v695_v27 }
  0x3c   :  { %380 = vmatpush.bf16.msra.mxu2 %v619_v31  ;;  %v870_v31 = vld [vmem:[%s1123_s8] ss:$0 sm:$0xff] }
  0x3d   :  { %393 = vmatpush.bf16.msra.mxu3 %v683_v35 }
  0x3e   :  { %406 = vmatpush.bf16.msrb.mxu0 %v623_v36 }
  0x3f   :  { %419 = vmatpush.bf16.msrb.mxu1 %v687_v39 }
  0x40   :  { %561 = vmatpush.bf16.msrb.mxu2 %v849_v41 }
  0x41   :  { %574 = vmatpush.bf16.msrb.mxu3 %v857_v40 }
  0x44   :  { %562 = vmatpush.bf16.msrb.mxu2 %v848_v43 }
  0x45   :  { %575 = vmatpush.bf16.msrb.mxu3 %v856_v42 }
  0x48   :  { %563 = vmatpush.bf16.msrb.mxu2 %v847_v45 }
  0x49   :  { %576 = vmatpush.bf16.msrb.mxu3 %v855_v44 }
  0x4c   :  { %564 = vmatpush.bf16.msrb.mxu2 %v846_v47 }
  0x4d   :  { %577 = vmatpush.bf16.msrb.mxu3 %v854_v46 }
  0x50   :  { %565 = vmatpush.bf16.msrb.mxu2 %v845_v63 }
  0x51   :  { %578 = vmatpush.bf16.msrb.mxu3 %v853_v48 }
  0x54   :  { %566 = vmatpush.bf16.msrb.mxu2 %v844_v1 }
  0x55   :  { %579 = vmatpush.bf16.msrb.mxu3 %v852_v50 }
  0x58   :  { %567 = vmatpush.bf16.msrb.mxu2 %v843_v3 }
  0x59   :  { %580 = vmatpush.bf16.msrb.mxu3 %v851_v0 }
  0x5c   :  { %568 = vmatpush.bf16.msrb.mxu2 %v842_v4 }
  0x5d   :  { %581 = vmatpush.bf16.msrb.mxu3 %v850_v2 }
  0x9e   :  { %v154_v53 = vpop.f32.mrf.mxu0 }
  0x9f   :  { %v155_v54 = vadd.f32 %v154_v53, %v127_v51  ;;  %v167_v55 = vpop.f32.mrf.mxu1 }
  0xa0   :  { %v168_v56 = vadd.f32 %v167_v55, %v128_v52 }
  0xa1   :  { %v171_v57 = vmax.f32 %v155_v54, 0.0 }
  0xa2   :  { %v172_v58 = vmax.f32 %v168_v56, 0.0 }
  0xa3   :  { %v173_v59 = vpack.c.bf16 %v171_v57, %v171_v57 }
  0xa4   :  { %v174_v60 = vpack.c.bf16 %v172_v58, %v172_v58 }
  0xa5   :  { %381 = vmatmul.bf16.vlgmr.msra.gmra.mxu2 %v173_v59  ;;  %407 = vmatmul.bf16.vlgmr.msrb.gmra.mxu0 %v173_v59 }
  0xa6   :  { %394 = vmatmul.bf16.vlgmr.msra.gmra.mxu3 %v174_v60  ;;  %420 = vmatmul.bf16.vlgmr.msrb.gmra.mxu1 %v174_v60  ;;  %v156_v61 = vpop.f32.mrf.mxu0 }
  0xa7   :  { %v169_v62 = vpop.f32.mrf.mxu1 }
 0x122   :  { %v408_v7 = vpop.f32.mrf.mxu0 }
 0x123   :  { %v409_v8 = vadd.f32 %v408_v7, %v210_v6  ;;  %v421_v9 = vpop.f32.mrf.mxu1 }
 0x125   :  { %v422_v10 = vadd.f32 %v421_v9, %v409_v8 }
 0x127   :  { %v426_v12 = vmax.f32 %v422_v10, 0.0 }
 0x128   :  { %v382_v13 = vpop.f32.mrf.mxu2 }
 0x129   :  { %v428_v14 = vpack.c.bf16 %v426_v12, %v426_v12  ;;  %v383_v15 = vadd.f32 %v382_v13, %v209_v11  ;;  %v395_v16 = vpop.f32.mrf.mxu3 }
 0x12a   :  { %v410_v17 = vpop.f32.mrf.mxu0 }
 0x12b   :  { %v396_v18 = vadd.f32 %v395_v16, %v383_v15  ;;  %v423_v19 = vpop.f32.mrf.mxu1  ;;  %582 = vmatmul.bf16.vlgmr.msrb.gmra.mxu3 %v428_v14 }
 0x12d   :  { %v425_v20 = vmax.f32 %v396_v18, 0.0 }
 0x12f   :  { %v427_v21 = vpack.c.bf16 %v425_v20, %v425_v20 }
 0x130   :  { %v384_v22 = vpop.f32.mrf.mxu2 }
 0x131   :  { %v397_v23 = vpop.f32.mrf.mxu3  ;;  %569 = vmatmul.bf16.vlgmr.msrb.gmra.mxu2 %v427_v21 }
 0x1ae   :  { %v583_v24 = vpop.f32.mrf.mxu3 }
 0x1b4   :  { %v570_v26 = vpop.f32.mrf.mxu2 }
 0x1b5   :  { %v571_v27 = vadd.f32 %v868_v25, %v570_v26 }
 0x1b6   :  { %v585_v29 = vpop.f32.mrf.mxu3 }
 0x1b7   :  { %v584_v30 = vadd.f32 %v583_v24, %v571_v27 }
 0x1b9   :  { %v591_v32 = vmax.f32 %v584_v30, %v869_v28 }
 0x1bb   :  { %v596_v33 = vmin.f32 %v591_v32, %v870_v31 }
 0x1bc   :  { %v572_v34 = vpop.f32.mrf.mxu2 }
 0x1bd   :  { %597 = vst [vmem:[%s1124_s9] sm:$0xff] %v596_v33 }
 0x1be   :  { %602 = vsyncpa [#allocation3], 1 }
 0x1bf   :  { %603 = vsyncpa [#allocation5], 1 }
 0x1c0   :  { %604 = vsyncpa [#allocation8], 1 }
 0x1c1   :  { %605 = vsyncpa [#allocation11], 1 }

</bundles_post_ra>
